<compile_context>
chip_gen: v5e
topology: v5e:2x2
jax: 0.10.0
libtpu: 0.0.40
codegen_flags: <defaults>
</compile_context>

<pallas_src>
import functools

import jax
import jax.numpy as jnp
from jax import lax
from jax.experimental import pallas as pl
from jax.experimental.pallas import tpu as pltpu


def _round_up(x, m):
    return ((x + m - 1) // m) * m


def _word_rep_kernel(idx_ref, w_ref, out_ref, *, dropout_rate, train, seed):
    """One grid step: gather T embedding rows via one-hot MXU matmul,
    optionally apply fused inverted dropout, and store one dense block.

    idx_ref : VMEM (T, 1)      int32   -- token ids for this block
    w_ref   : VMEM (Vpad, Epad) float32 -- full embedding table (resident)
    out_ref : VMEM (T, Epad)   float32 -- output block
    """
    T, Epad = out_ref.shape
    V = w_ref.shape[0]

    ids = idx_ref[...]                                    # (T, 1) int32
    iota_v = lax.broadcasted_iota(jnp.int32, (T, V), 1)   # (T, V)
    # One-hot selector; ids outside [0, V) yield an all-zero row (safe).
    onehot = (iota_v == ids).astype(jnp.float32)
    gathered = jnp.dot(onehot, w_ref[...],
                       preferred_element_type=jnp.float32,
                       precision=lax.Precision.HIGHEST)   # exact row select

    if train and dropout_rate > 0.0:
        # Fused inverted dropout. Counter-based hash PRNG: unique per-element
        # 32-bit counter mixed with the seed, two xorshift-multiply rounds,
        # then compare raw uint32 bits against uint32(p * 2^32) and fold the
        # 1/(1-p) scale into a single multiply (2-3 VPU ops / element).
        blk = pl.program_id(0)
        row = lax.broadcasted_iota(jnp.int32, (T, Epad), 0) + blk * T
        col = lax.broadcasted_iota(jnp.int32, (T, Epad), 1)
        ctr = (row * Epad + col).astype(jnp.uint32)
        seed_mix = (int(seed) * 0x9E3779B9) & 0xFFFFFFFF
        u = ctr + jnp.uint32(seed_mix)
        u = (u ^ (u >> 16)) * jnp.uint32(0x7FEB352D)
        u = (u ^ (u >> 15)) * jnp.uint32(0x846CA68B)
        u = u ^ (u >> 16)
        thresh = jnp.uint32(min(int(round(dropout_rate * 2.0 ** 32)),
                                2 ** 32 - 1))
        keep = (u >= thresh).astype(jnp.float32)
        scale = jnp.float32(1.0 / (1.0 - dropout_rate))
        gathered = gathered * (keep * scale)

    out_ref[...] = gathered.astype(out_ref.dtype)


def word_rep_forward(x_idx, W, *, dropout_rate=0.0, train=False, seed=0,
                     block_tokens=512):
    """Forward pass of WordRep (embed_file / elmo disabled path):
    nn.Embedding(x) followed by nn.Dropout(p)."""
    assert 0.0 <= dropout_rate < 1.0
    B, S = x_idx.shape
    V, E = W.shape
    N = B * S

    # Lane-pad E to a multiple of 128 (dense unmasked writeback) and pad V to
    # a multiple of 8 (sublane-aligned table block).  Padding is zeros.
    Epad = _round_up(E, 128)
    Vpad = _round_up(V, 8)
    if (Epad, Vpad) != (E, V):
        W = jnp.pad(W, ((0, Vpad - V), (0, Epad - E)))

    table_bytes = Vpad * Epad * W.dtype.itemsize
    # VMEM-resident-table (one-hot matmul) path: small/medium vocab only.
    # 4 MiB cap keeps the (possibly 2x-buffered) table + output blocks well
    # inside v7x's 32 MiB default-scoped / 64 MiB physical VMEM per core.
    assert table_bytes <= 4 * 1024 * 1024, (
        "embedding table too large for the VMEM-resident gather path")

    # Token-block size: multiple of 8 (sublane dense), capped at block_tokens.
    T = _round_up(min(block_tokens, _round_up(N, 8)), 8)
    n_blocks = pl.cdiv(N, T)
    Npad = n_blocks * T

    idx = x_idx.reshape(N).astype(jnp.int32)
    if Npad != N:
        # Padded ids are 0; the padded output rows are sliced off below.
        idx = jnp.pad(idx, (0, Npad - N))
    idx = idx.reshape(Npad, 1)

    kernel = functools.partial(
        _word_rep_kernel,
        dropout_rate=float(dropout_rate),
        train=bool(train),
        seed=int(seed),
    )

    out_block_bytes = T * Epad * W.dtype.itemsize
    # 2x table (default double-buffering of the invariant block) +
    # 2x output block + 2x id block + 1 MiB slack.
    vmem_need = 2 * table_bytes + 2 * out_block_bytes + 2 * T * 4 + (1 << 20)
    vmem_limit = int(min(max(vmem_need, 32 << 20), 100 << 20))

    bytes_accessed = Npad * 4 + table_bytes + Npad * Epad * W.dtype.itemsize
    flops = 2 * Npad * Vpad * Epad   # one-hot MXU gather

    out = pl.pallas_call(
        kernel,
        out_shape=jax.ShapeDtypeStruct((Npad, Epad), W.dtype),
        grid=(n_blocks,),
        in_specs=[
            # Per-block token ids (no whole-array SMEM prefetch).
            pl.BlockSpec((T, 1), lambda i: (i, 0)),
            # Full embedding table: constant index map -> DMA'd once and
            # resident across grid steps.
            pl.BlockSpec((Vpad, Epad), lambda i: (0, 0)),
        ],
        out_specs=pl.BlockSpec((T, Epad), lambda i: (i, 0)),
        compiler_params=pltpu.CompilerParams(
            dimension_semantics=("parallel",),
            vmem_limit_bytes=vmem_limit),
        cost_estimate=pl.CostEstimate(
            flops=int(flops), transcendentals=0,
            bytes_accessed=int(bytes_accessed)),
    )(idx, W)

    return out[:N, :E].reshape(B, S, E)


if __name__ == "__main__":
    # Shapes implied by the module: vocab = len(w2ind) + 2, embed_size = E.
    B, S = 2, 8
    VOCAB = 32 + 2          # len(dicts['w2ind']) + 2
    E = 128                 # args.embed_size (lane-friendly)

    key = jax.random.PRNGKey(0)
    k_w, k_x, k_w2 = jax.random.split(key, 3)

    # Deterministic table; padding_idx=0 row zeroed like nn.Embedding(padding_idx=0).
    W = jax.random.normal(k_w, (VOCAB, E), dtype=jnp.float32)
    W = W.at[0].set(0.0)
    x = jax.random.randint(k_x, (B, S), minval=0, maxval=VOCAB, dtype=jnp.int32)

    ref = W[x]

    # Eval mode: dropout is identity -> exact match against plain-JAX gather.
    out = jax.block_until_ready(word_rep_forward(x, W))
    assert out.shape == (B, S, E)
    assert jnp.allclose(out, ref, atol=1e-6), "Pallas embedding gather mismatch"

    # Non-multiple-of-128 embed size exercises the lane-padding path.
    E2 = 100
    W2 = jax.random.normal(k_w2, (VOCAB, E2), dtype=jnp.float32)
    W2 = W2.at[0].set(0.0)
    out2 = jax.block_until_ready(word_rep_forward(x, W2))
    assert out2.shape == (B, S, E2)
    assert jnp.allclose(out2, W2[x], atol=1e-6), "lane-padded gather mismatch"

    # Training mode: fused inverted dropout (p=0.5).  Every element must be
    # either exactly dropped (0) or the gathered value scaled by 1/(1-p).
    p = 0.5
    out_tr = jax.block_until_ready(
        word_rep_forward(x, W, dropout_rate=p, train=True, seed=1234))
    scaled = ref / (1.0 - p)
    on_lattice = (jnp.abs(out_tr) < 1e-6) | (jnp.abs(out_tr - scaled) < 1e-4)
    assert bool(jnp.all(on_lattice)), (
        "Fused dropout produced values off the {0, x/(1-p)} lattice")
    zero_frac = float(jnp.mean((jnp.abs(out_tr) < 1e-6).astype(jnp.float32)))
    assert 0.1 < zero_frac < 0.9, "dropout mask degenerate (all kept / all dropped)"

    print("KERNEL_OK")
</pallas_src>

<mosaic_0001>
module attributes {stable_mosaic.version = 11 : i64} {
  func.func @_word_rep_kernel(%arg0: i32, %arg1: memref<16x1xi32, #tpu.memory_space<vmem>>, %arg2: memref<40x128xf32, #tpu.memory_space<vmem>>, %arg3: memref<16x128xf32, #tpu.memory_space<vmem>>) attributes {dimension_semantics = [#tpu.dimension_semantics<parallel>], iteration_bounds = array<i64: 1>, scalar_prefetch = 0 : i64, scratch_operands = 0 : i64, tpu.core_type = #tpu.core_type<tc>, window_params = [{transform_indices = @transform_0, window_bounds = array<i64: 16, 1>}, {pipeline_mode = #tpu.pipeline_mode<synchronous>, transform_indices = @transform_1, window_bounds = array<i64: 40, 128>}, {transform_indices = @transform_2, window_bounds = array<i64: 16, 128>}]} {
    %c0 = arith.constant 0 : index
    %c0_0 = arith.constant 0 : index
    %0 = vector.load %arg1[%c0, %c0_0] : memref<16x1xi32, #tpu.memory_space<vmem>>, vector<16x1xi32>
    %1 = tpu.iota {dimensions = array<i32: 1>} : vector<16x40xi32>
    %2 = vector.broadcast %0 : vector<16x1xi32> to vector<16x40xi32>
    %3 = arith.cmpi eq, %1, %2 : vector<16x40xi32>
    %4 = arith.extui %3 : vector<16x40xi1> to vector<16x40xi32>
    %5 = arith.sitofp %4 : vector<16x40xi32> to vector<16x40xf32>
    %c0_1 = arith.constant 0 : index
    %c0_2 = arith.constant 0 : index
    %6 = vector.load %arg2[%c0_1, %c0_2] : memref<40x128xf32, #tpu.memory_space<vmem>>, vector<40x128xf32>
    %cst = arith.constant dense<0.000000e+00> : vector<16x128xf32>
    %7 = tpu.matmul %5, %6, %cst {dimension_numbers = #tpu.dot_dimension_numbers<[1], [0], [0], [1], [0, 0, 1, 1], [], []>, precision = #tpu.contract_precision<fp32>} : vector<16x40xf32>, vector<40x128xf32>, vector<16x128xf32> -> vector<16x128xf32>
    %c0_3 = arith.constant 0 : index
    %c0_4 = arith.constant 0 : index
    %8 = vector.load %arg3[%c0_3, %c0_4] : memref<16x128xf32, #tpu.memory_space<vmem>>, vector<16x128xf32>
    tpu.vector_store %arg3[%c0_3, %c0_4], %7 {strides = array<i32>} : memref<16x128xf32, #tpu.memory_space<vmem>>, vector<16x128xf32>,
    return
  }
  func.func @transform_0(%arg0: i32) -> (i32, i32) {
    %c0_i32 = arith.constant 0 : i32
    %c0_i32_0 = arith.constant 0 : i32
    return %arg0, %c0_i32 : i32, i32
  }
  func.func @transform_1(%arg0: i32) -> (i32, i32) {
    %c0_i32 = arith.constant 0 : i32
    %c0_i32_0 = arith.constant 0 : i32
    %c0_i32_1 = arith.constant 0 : i32
    return %c0_i32, %c0_i32_0 : i32, i32
  }
  func.func @transform_2(%arg0: i32) -> (i32, i32) {
    %c0_i32 = arith.constant 0 : i32
    %c0_i32_0 = arith.constant 0 : i32
    return %arg0, %c0_i32 : i32, i32
  }
}

</mosaic_0001>

<bundles_post_ra>
// kernel: tpu_custom_call.1
= control target key start
LH: loop header
LB: loop body
LE: loop exit
PB: predicated region body
PF: predicated region fallthrough
CT: control target
= control target key end

     0   :  { %7 = vsyncpa [#allocation3], 0  ;;  %s430_s0 = inlined_call_operand.vmem [shape: s32[16,1], index: 0, kind: input, shape index: {}]   ;;  %s431_s1 = inlined_call_operand.hbm [shape: f32[40,128], index: 1, kind: input, shape index: {}]   ;;  %s432_s2 = inlined_call_operand.hbm [shape: f32[16,128], index: 2, kind: output, shape index: {}]  }
   0x1   :  { %8 = vsyncpa [#allocation4], 0  ;;  %s15_s11 = sshll.u32 %s431_s1, 4  ;;  %s383_s12 = smov [#allocation2]   ;;  %s16_s11 = int_to_ptr.hbm [resolvable:$true] %s15_s11 }
   0x2   :  { %s17_s13 = sshll.u32 %s383_s12, 4  ;;  %s384_s14 = smov 128   ;;  %s18_s13 = int_to_ptr.vmem [resolvable:$true] %s17_s13 }
   0x3   :  { %s385_s15 = smov 8  }
   0x4   :  { %23 = dma.hbm_to_vmem [thread:$0]  %s16_s11, 640, %s18_s13, [#allocation3], %s384_s14, %s384_s14, %s385_s15  }
   0x5   :  { %379 = dma.done.wait [#allocation3], 640  }
   0x6   :  { %380 = vsyncadd [#allocation3], 4294966656  ;;  %v386_v0 = vmov 0   ;;  %v28_v1 = vld [vmem:[%s430_s0] sm:$0xff]  ;;  %v47_v4 = vld [vmem:[#allocation2 + $0x18] sm:$0xff]  ;;  %v30_v33 = vlaneseq  ;;  %vm49_vm0 = vcmask 326656  }
   0x7   :  { %330 = vset.pattern.permute.xlu0 %v386_v0  ;;  %v48_v2 = vld [vmem:[#allocation2 + $0x20] sm:$0xff]  ;;  %v46_v5 = vld [vmem:[#allocation2 + $0x10] sm:$0xff]  ;;  %v45_v6 = vld [vmem:[#allocation2 + $0x8] sm:$0xff]  ;;  %v69_v7 = vand.u32 4294901760, %v47_v4  ;;  %v387_v36 = vmov 0.0   ;;  %s293_s22 = sshll.u32 %s432_s2, 4  ;;  %s294_s22 = int_to_ptr.hbm [resolvable:$true] %s293_s22 }
   0x8   :  { %33 = vperm.xlu0 %330, %v28_v1   ;;  %v67_v3 = vand.u32 4294901760, %v48_v2  ;;  %v71_v8 = vand.u32 4294901760, %v46_v5  ;;  %v73_v9 = vand.u32 4294901760, %v45_v6  ;;  %v29_v15 = vld [vmem:[%s430_s0 + $0x8] sm:$0xff]  ;;  %v44_v27 = vld [vmem:[#allocation2] sm:$0xff]  ;;  %v31_v34 = vand.u32 127, %v30_v33 }
   0x9   :  { %v112_v11 = vsub.f32 %v47_v4, %v69_v7  ;;  %v75_v28 = vand.u32 4294901760, %v44_v27  ;;  %s388_s0 = smov [#allocation5]  }
   0xa   :  { %v106_v10 = vsub.f32 %v48_v2, %v67_v3  ;;  %193 = vmatpush.msra.mxu3 %v67_v3  ;;  %68 = vmatpush.msra.mxu0 %v67_v3  ;;  %v118_v12 = vsub.f32 %v46_v5, %v71_v8  ;;  %v124_v13 = vsub.f32 %v45_v6, %v73_v9  ;;  %s291_s19 = sshll.u32 %s388_s0, 4  ;;  %s292_s19 = int_to_ptr.vmem [resolvable:$true] %s291_s19 }
   0xb   :  { %v113_v16 = vand.u32 4294901760, %v112_v11  ;;  %v130_v29 = vsub.f32 %v44_v27, %v75_v28 }
   0xc   :  { %v107_v14 = vand.u32 4294901760, %v106_v10  ;;  %157 = vmatpush.msra.mxu2 %v106_v10  ;;  %195 = vmatpush.msra.mxu3 %v69_v7  ;;  %v119_v17 = vand.u32 4294901760, %v118_v12  ;;  %v125_v18 = vand.u32 4294901760, %v124_v13 }
   0xd   :  { %70 = vmatpush.msra.mxu0 %v69_v7  ;;  %v114_v20 = vsub.f32 %v112_v11, %v113_v16  ;;  %v131_v30 = vand.u32 4294901760, %v130_v29 }
   0xe   :  { %v108_v19 = vsub.f32 %v106_v10, %v107_v14  ;;  %160 = vmatpush.msra.mxu2 %v112_v11  ;;  %197 = vmatpush.msra.mxu3 %v71_v8  ;;  %v120_v21 = vsub.f32 %v118_v12, %v119_v17  ;;  %v126_v23 = vsub.f32 %v124_v13, %v125_v18 }
   0xf   :  { %72 = vmatpush.msra.mxu0 %v71_v8  ;;  %v115_v24 = vand.u32 4294901760, %v114_v20  ;;  %v132_v31 = vsub.f32 %v130_v29, %v131_v30 }
  0x10   :  { %36 = vperm.xlu0 %330, %v29_v15   ;;  %v109_v22 = vand.u32 4294901760, %v108_v19  ;;  %163 = vmatpush.msra.mxu2 %v118_v12  ;;  %v121_v25 = vand.u32 4294901760, %v120_v21  ;;  %v127_v26 = vand.u32 4294901760, %v126_v23 }
  0x11   :  { %199 = vmatpush.msra.mxu3 %v73_v9  ;;  %74 = vmatpush.msra.mxu0 %v73_v9  ;;  %v133_v32 = vand.u32 4294901760, %v132_v31 }
  0x12   :  { %110 = vmatpush.msra.mxu1 %v109_v22  ;;  %166 = vmatpush.msra.mxu2 %v124_v13 }
  0x13   :  { %201 = vmatpush.msra.mxu3 %v75_v28  ;;  %76 = vmatpush.msra.mxu0 %v75_v28 }
  0x14   :  { %116 = vmatpush.msra.mxu1 %v115_v24  ;;  %169 = vmatpush.msra.mxu2 %v130_v29 }
  0x15   :  { %319 = vmatpush.msrb.mxu3 %v67_v3  ;;  %229 = vmatpush.msrb.mxu0 %v107_v14 }
  0x16   :  { %122 = vmatpush.msra.mxu1 %v121_v25  ;;  %314 = vmatpush.msrb.mxu2 %v107_v14 }
  0x17   :  { %320 = vmatpush.msrb.mxu3 %v69_v7  ;;  %233 = vmatpush.msrb.mxu0 %v113_v16 }
  0x18   :  { %128 = vmatpush.msra.mxu1 %v127_v26  ;;  %315 = vmatpush.msrb.mxu2 %v113_v16 }
  0x19   :  { %321 = vmatpush.msrb.mxu3 %v71_v8  ;;  %237 = vmatpush.msrb.mxu0 %v119_v17 }
  0x1a   :  { %316 = vmatpush.msrb.mxu2 %v119_v17  ;;  %134 = vmatpush.msra.mxu1 %v133_v32 }
  0x1b   :  { %322 = vmatpush.msrb.mxu3 %v73_v9  ;;  %241 = vmatpush.msrb.mxu0 %v125_v18 }
  0x1c   :  { %267 = vmatpush.msrb.mxu1 %v67_v3  ;;  %317 = vmatpush.msrb.mxu2 %v125_v18 }
  0x1d   :  { %323 = vmatpush.msrb.mxu3 %v75_v28  ;;  %245 = vmatpush.msrb.mxu0 %v131_v30 }
  0x1e   :  { %269 = vmatpush.msrb.mxu1 %v69_v7  ;;  %318 = vmatpush.msrb.mxu2 %v131_v30 }
  0x20   :  { %271 = vmatpush.msrb.mxu1 %v71_v8 }
  0x22   :  { %273 = vmatpush.msrb.mxu1 %v73_v9 }
  0x24   :  { %275 = vmatpush.msrb.mxu1 %v75_v28 }
  0x7a   :  { %v34_v35 = vpop.permute.xlu0 %33 }
  0x7b   :  { %vm38_vm1 = vcmp.eq.s32.totalorder %v31_v34, %v34_v35 }
  0x7c   :  { %v306_v37 = vsel %vm38_vm1, 1.0, %v387_v36 }
  0x7d   :  { %308 = vmatmul.msk.f32.vlgmr.msra.gmra.mxu1 %vm49_vm0, %v306_v37  ;;  %v51_v38 = vsel %vm49_vm0, %v306_v37, 0 }
  0x7e   :  { %v78_v39 = vsub.f32 %v51_v38, %v51_v38 }
  0x80   :  { %172 = vmatmul.f32.vlgmr.msra.gmra.mxu2 %v78_v39  ;;  %v79_v40 = vand.u32 4294901760, %v78_v39 }
  0x82   :  { %205 = vmatmul.f32.vlgmr.msra.gmra.mxu3 %v79_v40  ;;  %v37_v41 = vpop.permute.xlu0 %36  ;;  %v80_v42 = vsub.f32 %v78_v39, %v79_v40 }
  0x83   :  { %vm39_vm2 = vcmp.eq.s32.totalorder %v31_v34, %v37_v41 }
  0x84   :  { %v307_v43 = vsel %vm39_vm2, 1.0, %v387_v36  ;;  %v81_v44 = vand.u32 4294901760, %v80_v42 }
  0x85   :  { %309 = vmatmul.msk.f32.gmra.mxu1 %vm49_vm0, %v307_v43  ;;  %v54_v45 = vsel %vm49_vm0, %v307_v43, 0 }
  0x86   :  { %82 = vmatmul.f32.vlgmr.msra.gmra.mxu0 %v81_v44  ;;  %v86_v46 = vsub.f32 %v54_v45, %v54_v45 }
  0x88   :  { %177 = vmatmul.f32.gmra.mxu2 %v86_v46  ;;  %v87_v47 = vand.u32 4294901760, %v86_v46 }
  0x8a   :  { %211 = vmatmul.f32.gmra.mxu3 %v87_v47  ;;  %v88_v48 = vsub.f32 %v86_v46, %v87_v47 }
  0x8c   :  { %v89_v49 = vand.u32 4294901760, %v88_v48 }
  0x8d   :  { %312 = vmatmul.msk.f32.vlgmr.msrb.gmra.mxu1 %vm49_vm0, %v306_v37 }
  0x8e   :  { %90 = vmatmul.f32.gmra.mxu0 %v89_v49 }
  0x90   :  { %311 = vmatmul.msk.f32.vlgmr.msrb.gmra.mxu2 %vm49_vm0, %v307_v43 }
  0x92   :  { %313 = vmatmul.msk.f32.vlgmr.msrb.gmra.mxu3 %vm49_vm0, %v307_v43 }
  0x96   :  { %310 = vmatmul.msk.f32.vlgmr.msrb.gmra.mxu0 %vm49_vm0, %v306_v37 }
  0xfa   :  { %v137_v50 = vpop.f32.mrf.mxu1 }
 0x102   :  { %v141_v54 = vpop.f32.mrf.mxu1 }
 0x103   :  { %v83_v51 = vpop.f32.mrf.mxu0  ;;  %v173_v52 = vpop.f32.mrf.mxu2 }
 0x104   :  { %v138_v55 = vadd.f32 %v137_v50, %v83_v51 }
 0x105   :  { %v206_v53 = vpop.f32.mrf.mxu3 }
 0x106   :  { %v174_v60 = vadd.f32 %v173_v52, %v138_v55 }
 0x108   :  { %v207_v62 = vadd.f32 %v206_v53, %v174_v60 }
 0x10a   :  { %v278_v4 = vpop.f32.mrf.mxu1 }
 0x10b   :  { %v91_v56 = vpop.f32.mrf.mxu0  ;;  %v178_v57 = vpop.f32.mrf.mxu2 }
 0x10c   :  { %v142_v58 = vadd.f32 %v141_v54, %v91_v56 }
 0x10d   :  { %v212_v59 = vpop.f32.mrf.mxu3 }
 0x10e   :  { %v179_v61 = vadd.f32 %v178_v57, %v142_v58 }
 0x110   :  { %v213_v63 = vadd.f32 %v212_v59, %v179_v61 }
 0x113   :  { %v248_v0 = vpop.f32.mrf.mxu0  ;;  %v252_v1 = vpop.f32.mrf.mxu2 }
 0x114   :  { %v249_v2 = vadd.f32 %v248_v0, %v207_v62  ;;  %v253_v3 = vadd.f32 %v252_v1, %v213_v63 }
 0x115   :  { %v282_v5 = vpop.f32.mrf.mxu3 }
 0x116   :  { %v279_v6 = vadd.f32 %v278_v4, %v249_v2  ;;  %v283_v7 = vadd.f32 %v282_v5, %v253_v3 }
 0x118   :  { %285 = vst [vmem:[#allocation5] sm:$0xff] %v279_v6 }
 0x119   :  { %286 = vst [vmem:[#allocation5 + $0x8] sm:$0xff] %v283_v7 }
 0x11a   :  { %299 = dma.vmem_to_hbm [thread:$0]  %s292_s19, 256, %s294_s22, [#allocation4], %s384_s14, %s384_s14, %s385_s15  }
 0x11b   :  { %381 = dma.done.wait [#allocation4], 256  }
 0x11c   :  { %382 = vsyncadd [#allocation4], 4294967040 }
 0x11d   :  { %304 = vsyncpa [#allocation3], 1 }
 0x11e   :  { %305 = vsyncpa [#allocation4], 1 }

</bundles_post_ra>
